<compile_context>
chip_gen: v5e
topology: v5e:2x2
jax: 0.10.0
libtpu: 0.0.40
codegen_flags: <defaults>
</compile_context>

<pallas_src>
import functools

import jax
import jax.numpy as jnp
from jax.experimental import pallas as pl
from jax.experimental.pallas import tpu as pltpu


def _eca_kernel(x_ref, w_ref, o_ref, *, k_size, channels):
    # x_ref: (C, HW)   one batch element (leading batch dim squeezed by BlockSpec)
    # w_ref: (k_size,) conv taps, SMEM-resident
    # o_ref: (C, HW)
    x = x_ref[...]

    # Global average pool over the spatial (lane) axis, accumulated in f32.
    mean = jnp.mean(x, axis=-1, keepdims=True, dtype=jnp.float32)        # (C, 1)

    # 1D conv over channels (cross-correlation, zero padding, no bias):
    #   conv[c] = sum_j w[j] * mean[c + j - pad]
    # as k shifted multiply-adds on the zero-padded (C, 1) vector -- pure VPU work.
    pad = (k_size - 1) // 2
    if pad > 0:
        zeros = jnp.zeros((pad, 1), jnp.float32)
        mean_p = jnp.concatenate([zeros, mean, zeros], axis=0)           # (C + 2*pad, 1)
    else:
        mean_p = mean
    conv = jnp.zeros((channels, 1), jnp.float32)
    for j in range(k_size):
        conv = conv + w_ref[j] * mean_p[j:j + channels, :]

    attn = jax.nn.sigmoid(conv)                                          # (C, 1) f32

    # Scale in the native dtype; (C, 1) broadcasts across the lane axis.
    o_ref[...] = x * attn.astype(o_ref.dtype)


@functools.partial(jax.jit, static_argnames=("k_size",))
def eca_layer(x, conv_weight, k_size=3):
    """ECA forward. x: (B, C, H, W); conv_weight: (k_size,) (or (1,1,k_size))."""
    B, C, H, W = x.shape
    HW = H * W
    x3 = x.reshape(B, C, HW)
    w = conv_weight.reshape(-1).astype(jnp.float32)

    itemsize = x.dtype.itemsize
    block_bytes = C * HW * itemsize
    # 2x double-buffered input + 2x double-buffered output + slack; keep within
    # v7x's 64 MiB physical VMEM while raising v5e's 16 MiB default when useful.
    vmem_limit = int(min(max(6 * block_bytes, 16 * 1024 * 1024), 96 * 1024 * 1024))

    kernel = functools.partial(_eca_kernel, k_size=k_size, channels=C)

    out3 = pl.pallas_call(
        kernel,
        out_shape=jax.ShapeDtypeStruct((B, C, HW), x.dtype),
        grid_spec=pltpu.PrefetchScalarGridSpec(
            num_scalar_prefetch=0,
            grid=(B,),
            in_specs=[
                pl.BlockSpec((None, C, HW), lambda b: (b, 0, 0)),
                pl.BlockSpec(memory_space=pltpu.MemorySpace.SMEM),
            ],
            out_specs=pl.BlockSpec((None, C, HW), lambda b: (b, 0, 0)),
        ),
        compiler_params=pltpu.CompilerParams(
            dimension_semantics=("parallel",),
            vmem_limit_bytes=vmem_limit,
        ),
        cost_estimate=pl.CostEstimate(
            flops=2 * B * C * HW,              # pool reduction + final scale
            transcendentals=B * C,             # sigmoid
            bytes_accessed=2 * B * C * HW * itemsize,
        ),
    )(x3, w)

    return out3.reshape(B, C, H, W)


def _eca_reference(x, conv_weight):
    """Pure-JAX reference matching the PyTorch module."""
    k = conv_weight.shape[0]
    pad = (k - 1) // 2
    mean = jnp.mean(x, axis=(2, 3))                     # (B, C)
    mp = jnp.pad(mean, ((0, 0), (pad, pad)))            # (B, C + 2*pad)
    conv = sum(conv_weight[j] * mp[:, j:j + mean.shape[1]] for j in range(k))
    attn = jax.nn.sigmoid(conv)                         # (B, C)
    return x * attn[:, :, None, None]


if __name__ == "__main__":
    key = jax.random.PRNGKey(0)
    kx, kw = jax.random.split(key)

    B, C, H, W = 2, 4, 16, 16
    k_size = 3

    x = jax.random.normal(kx, (B, C, H, W), dtype=jnp.float32)
    # nn.Conv1d(1, 1, k_size, bias=False) weight has shape (1, 1, k_size); we keep
    # just the (k_size,) taps, initialized deterministically.
    conv_weight = (jax.random.normal(kw, (k_size,), dtype=jnp.float32) * 0.5)

    out = eca_layer(x, conv_weight, k_size=k_size)
    out = jax.block_until_ready(out)

    ref = _eca_reference(x, conv_weight)
    assert out.shape == (B, C, H, W)
    assert jnp.allclose(out, ref, atol=1e-5, rtol=1e-5), "mismatch vs reference"

    print("KERNEL_OK")
</pallas_src>

<mosaic_0001>
module attributes {stable_mosaic.version = 11 : i64} {
  func.func @_eca_kernel(%arg0: i32, %arg1: memref<1x4x256xf32, #tpu.memory_space<vmem>>, %arg2: memref<3xf32, #tpu.memory_space<smem>>, %arg3: memref<1x4x256xf32, #tpu.memory_space<vmem>>) attributes {dimension_semantics = [#tpu.dimension_semantics<parallel>], iteration_bounds = array<i64: 2>, scalar_prefetch = 0 : i64, scratch_operands = 0 : i64, tpu.core_type = #tpu.core_type<tc>, window_params = [{transform_indices = @transform_0, window_bounds = array<i64: 1, 4, 256>}, {transform_indices = @transform_1, window_bounds = array<i64: 3>}, {transform_indices = @transform_2, window_bounds = array<i64: 1, 4, 256>}]} {
    %c0 = arith.constant 0 : index
    %c0_0 = arith.constant 0 : index
    %c0_1 = arith.constant 0 : index
    %0 = vector.load %arg1[%c0, %c0_0, %c0_1] : memref<1x4x256xf32, #tpu.memory_space<vmem>>, vector<1x4x256xf32>
    %1 = vector.shape_cast %0 : vector<1x4x256xf32> to vector<4x256xf32>
    %cst = arith.constant dense<0.000000e+00> : vector<4xf32>
    %2 = vector.multi_reduction <add>, %1, %cst [1] : vector<4x256xf32> to vector<4xf32>
    %3 = vector.shape_cast %2 : vector<4xf32> to vector<4x1xf32>
    %cst_2 = arith.constant 2.560000e+02 : f32
    %4 = vector.broadcast %cst_2 : f32 to vector<4x1xf32>
    %5 = arith.divf %3, %4 : vector<4x1xf32>
    %cst_3 = arith.constant 0.000000e+00 : f32
    %6 = vector.broadcast %cst_3 : f32 to vector<1x1xf32>
    %7 = tpu.concatenate %6, %5, %6 in 0 : vector<1x1xf32>, vector<4x1xf32>, vector<1x1xf32> -> vector<6x1xf32>
    %cst_4 = arith.constant 0.000000e+00 : f32
    %8 = vector.broadcast %cst_4 : f32 to vector<4x1xf32>
    %c0_5 = arith.constant 0 : index
    %9 = memref.load %arg2[%c0_5] : memref<3xf32, #tpu.memory_space<smem>>
    %10 = vector.extract_strided_slice %7 {offsets = [0, 0], sizes = [4, 1], strides = [1, 1]} : vector<6x1xf32> to vector<4x1xf32>
    %11 = vector.broadcast %9 : f32 to vector<4x1xf32>
    %12 = arith.mulf %11, %10 : vector<4x1xf32>
    %13 = arith.addf %8, %12 : vector<4x1xf32>
    %c1 = arith.constant 1 : index
    %14 = memref.load %arg2[%c1] : memref<3xf32, #tpu.memory_space<smem>>
    %15 = vector.extract_strided_slice %7 {offsets = [1, 0], sizes = [4, 1], strides = [1, 1]} : vector<6x1xf32> to vector<4x1xf32>
    %16 = vector.broadcast %14 : f32 to vector<4x1xf32>
    %17 = arith.mulf %16, %15 : vector<4x1xf32>
    %18 = arith.addf %13, %17 : vector<4x1xf32>
    %c2 = arith.constant 2 : index
    %19 = memref.load %arg2[%c2] : memref<3xf32, #tpu.memory_space<smem>>
    %20 = vector.extract_strided_slice %7 {offsets = [2, 0], sizes = [4, 1], strides = [1, 1]} : vector<6x1xf32> to vector<4x1xf32>
    %21 = vector.broadcast %19 : f32 to vector<4x1xf32>
    %22 = arith.mulf %21, %20 : vector<4x1xf32>
    %23 = arith.addf %18, %22 : vector<4x1xf32>
    %24 = arith.negf %23 : vector<4x1xf32>
    %25 = math.exp %24 : vector<4x1xf32>
    %cst_6 = arith.constant 1.000000e+00 : f32
    %26 = vector.broadcast %cst_6 : f32 to vector<4x1xf32>
    %27 = arith.addf %26, %25 : vector<4x1xf32>
    %28 = arith.divf %26, %27 : vector<4x1xf32>
    %29 = vector.broadcast %28 : vector<4x1xf32> to vector<4x256xf32>
    %30 = arith.mulf %1, %29 : vector<4x256xf32>
    %c0_7 = arith.constant 0 : index
    %c0_8 = arith.constant 0 : index
    %c0_9 = arith.constant 0 : index
    %31 = vector.load %arg3[%c0_7, %c0_8, %c0_9] : memref<1x4x256xf32, #tpu.memory_space<vmem>>, vector<1x4x256xf32>
    %32 = vector.shape_cast %31 : vector<1x4x256xf32> to vector<4x256xf32>
    %33 = vector.shape_cast %30 : vector<4x256xf32> to vector<1x4x256xf32>
    tpu.vector_store %arg3[%c0_7, %c0_8, %c0_9], %33 {strides = array<i32>} : memref<1x4x256xf32, #tpu.memory_space<vmem>>, vector<1x4x256xf32>,
    return
  }
  func.func @transform_0(%arg0: i32) -> (i32, i32, i32) {
    %c0_i32 = arith.constant 0 : i32
    %c0_i32_0 = arith.constant 0 : i32
    %c0_i32_1 = arith.constant 0 : i32
    return %arg0, %c0_i32, %c0_i32_0 : i32, i32, i32
  }
  func.func @transform_1(%arg0: i32) -> i32 {
    %c0_i32 = arith.constant 0 : i32
    %c0_i32_0 = arith.constant 0 : i32
    return %c0_i32 : i32
  }
  func.func @transform_2(%arg0: i32) -> (i32, i32, i32) {
    %c0_i32 = arith.constant 0 : i32
    %c0_i32_0 = arith.constant 0 : i32
    %c0_i32_1 = arith.constant 0 : i32
    return %arg0, %c0_i32, %c0_i32_0 : i32, i32, i32
  }
}

</mosaic_0001>

<bundles_post_ra>
// kernel: eca_layer.1
= control target key start
LH: loop header
LB: loop body
LE: loop exit
PB: predicated region body
PF: predicated region fallthrough
CT: control target
= control target key end

     0   :  { %7 = vsyncpa [#allocation3], 0  ;;  %s394_s9 = smov 0   ;;  %s425_s0 = inlined_call_operand.vmem [shape: f32[2,4,256], index: 0, kind: input, shape index: {}]   ;;  %s426_s1 = inlined_call_operand.vmem [shape: f32[3], index: 1, kind: input, shape index: {}]   ;;  %s427_s2 = inlined_call_operand.vmem [shape: f32[2,4,256], index: 2, kind: output, shape index: {}]  }
   0x1 LB: > { %s301_s10 = sadd.s32 4294967295, %s373_s9   ;;  %p303_p0 = scmp.ge.s32.totalorder %s373_s9, 1  ;;  %s373_s9 = sphi %s394_s9, %s13_s9  }
   0x2   : > { %p91_p1 = scmp.lt.s32.totalorder %s373_s9, 3  ;;  %s103_s13 = sshll.u32 %s426_s1, 4  ;;  %s104_s13 = int_to_ptr.vmem [resolvable:$true] %s103_s13 }
   0x3   : > { %p327_p3 = scmp.eq.s32.totalorder %s301_s10, 0  ;;  %s375_s14 = smov [#allocation2]  }
   0x4   : > { %p92_p2 = pnand %p303_p0, %p91_p1 }
   0x6   : > { %p323_p4 = pneg %p92_p2  ;;  %124 = sbr.rel (%p92_p2) target bundleno = 309 (0x135), region = 28 }
   0x8   : > { %p324_p5 = pnand %p327_p3, %p323_p4 }
   0xa   : > { %326 = dma.vmem_to_smem (!%p324_p5), %s104_s13, 16, %s375_s14, [#allocation3]  }
   0xb   : > { %368 = dma.done.wait (%p327_p3), [#allocation3], 16  }
   0xc   : > { %370 = vsyncadd (%p327_p3), [#allocation3], 4294967280 }
   0xd   : > { %131 = sfence }
   0xe   : > { %p148_p6 = scmp.lt.s32.totalorder %s301_s10, 1  ;;  %vm165_vm0 = vcmask 1043456   ;;  %v376_v6 = vmov 256.0   ;;  %s312_s19 = sld [smem:[#allocation2 + $0x1]]  ;;  %v377_v12 = vmov 0   ;;  %vm182_vm2 = vcmask 1040384  }
   0xf   : > { %342 = vrcp.f32 %v376_v6  ;;  %341 = vset.pattern.permute.xlu0 %v377_v12  ;;  %s313_s20 = sld [smem:[#allocation2 + $0x2]]  ;;  %vm184_vm3 = vcmask 1044480   ;;  %v378_v42 = vmov 839922192  }
  0x10   : > { %s429_s10 = smov (!%p148_p6, %s301_s10), 1  ;;  %s186_s21 = sld [smem:[#allocation2]]  ;;  %v228_v43 = vunpack.c.l.s4 %v378_v42 }
  0x11   : > { %s317_s15 = sshll.u32 %s429_s10, 3 }
  0x12   : > { %s152_s18 = scalar_lea.vmem %s425_s0, %s317_s15  ;;  %v229_v44 = vunpack.c.0.s8 %v228_v43  ;;  %s157_s24 = scalar_lea.vmem %s427_s2, %s317_s15 }
  0x13   : > { %v413_v0 = vld [vmem:[%s152_s18] sm:$0xff] }
  0x14   : > { %160 = vst [vmem:[#allocation1] ss:$2 sm:$0xff] %v413_v0  ;;  %v191_v17 = vstv %s312_s19 }
  0x15   : > { %v343_v7 = vpop.eup %342  ;;  %v198_v18 = vstv %s313_s20 }
  0x16   : > { %v172_v8 = vmul.f32 256.0, %v343_v7  ;;  %vm176_vm1 = vweird.f32 %v343_v7  ;;  %v187_v20 = vstv %s186_s21 }
  0x18   : > { %v173_v9 = vsub.f32 1.0, %v172_v8 }
  0x1a   : > { %v174_v10 = vmul.f32 %v343_v7, %v173_v9 }
  0x1b   : > { %v161_v1 = vld.sshfl [vmem:[#allocation1] sm:$0xff pattern:$0x75316420]  ;;  %v162_v2 = vld.sshfl [vmem:[#allocation1 + $0x8] sm:$0xff pattern:$0x75316420] }
  0x1c   : > { %v166_v3 = vsel %vm165_vm0, %v161_v1, 0.0  ;;  %v167_v4 = vsel %vm165_vm0, %v162_v2, 0.0  ;;  %v175_v11 = vadd.f32 %v343_v7, %v174_v10 }
  0x1d   : > { %v168_v5 = vadd.f32 %v167_v4, %v166_v3 }
  0x1e   : > { %v177_v13 = vsel %vm176_vm1, %v343_v7, %v175_v11 }
  0x1f   : > { %169 = vadd.xlane.f32.xlu0 %v168_v5 }
  0x92   : > { %v170_v14 = vpop.xlane.xlu0 %169 }
  0x93   : > { %v178_v15 = vmul.f32 %v177_v13, %v170_v14 }
  0x95   : > { %v180_v16 = vrot.slane %v178_v15, 7 }
  0x97   : > { %v183_v19 = vsel %vm182_vm2, 0.0, %v180_v16 }
  0x98   : > { %v185_v21 = vsel %vm184_vm3, %v183_v19, 0.0 }
  0x99   : > { %v192_v22 = vmul.f32 %v191_v17, %v185_v21  ;;  %v199_v23 = vmul.f32 %v198_v18, %v185_v21  ;;  %v188_v24 = vmul.f32 %v187_v20, %v185_v21 }
  0x9b   : > { %v194_v25 = vrot.slane %v192_v22, 1  ;;  %v201_v27 = vrot.slane %v199_v23, 2 }
  0x9d   : > { %v196_v26 = vadd.f32 %v194_v25, %v188_v24 }
  0x9f   : > { %v203_v28 = vadd.f32 %v201_v27, %v196_v26 }
  0xa1   : > { %v314_v29 = vmul.f32 -1.442695, %v203_v28 }
  0xa3   : > { %344 = vpow2.f32 %v314_v29 }
  0xa9   : > { %v345_v30 = vpop.eup %344 }
  0xaa   : > { %v207_v31 = vadd.f32 1.0, %v345_v30 }
  0xac   : > { %346 = vrcp.f32 %v207_v31  ;;  %v219_v35 = vand.u32 2147483648, %v207_v31  ;;  %v217_v37 = vand.u32 2147483647, %v207_v31  ;;  %vm213_vm5 = vweird.f32 %v207_v31 }
  0xae   : > { %v220_v39 = vor.u32 1.1754944e-38, %v219_v35  ;;  %vm218_vm7 = vcmp.eq.f32.partialorder %v217_v37, 8.507059e+37 }
  0xb2   : > { %v347_v32 = vpop.eup %346 }
  0xb3   : > { %v209_v33 = vmul.f32 %v347_v32, %v207_v31  ;;  %vm214_vm4 = vweird.f32 %v347_v32 }
  0xb4   : > { %vm215_vm6 = vmor %vm213_vm5, %vm214_vm4 }
  0xb5   : > { %v210_v34 = vsub.f32 1.0, %v209_v33 }
  0xb7   : > { %v211_v36 = vmul.f32 %v347_v32, %v210_v34 }
  0xb9   : > { %v212_v38 = vadd.f32 %v347_v32, %v211_v36 }
  0xbb   : > { %v216_v40 = vsel %vm215_vm6, %v347_v32, %v212_v38 }
  0xbc   : > { %v221_v41 = vsel %vm218_vm7, %v220_v39, %v216_v40 }
  0xbd   : > { %225 = vperm.xlu0 %341, %v221_v41  }
 0x12f   : > { %v226_v45 = vpop.permute.xlu0 %225 }
 0x130   : > { %v230_v46 = vperm.slane %v226_v45, %v229_v44 }
 0x132   : > { %v232_v47 = vmul.f32 %v230_v46, %v413_v0 }
 0x134   : > { %233 = vst [vmem:[%s157_s24] sm:$0xff] %v232_v47 }
 0x135 PF: > { %s13_s9 = sadd.s32 1, %s373_s9  }
 0x136   : > { %p10_p7 = scmp.ge.s32.totalorder %s13_s9, 4  }
 0x138   :  { %12 = sbr.rel (!%p10_p7) target bundleno = 1 (0x1), region = 63 }
 0x13d   :  { %255 = vsyncpa [#allocation3], 1 }
 0x13e   :  { %257 = vsyncpa [#allocation3 + $0x1], 1 }

</bundles_post_ra>
